<compile_context>
chip_gen: v7x
topology: tpu7x:2x2x1
jax: 0.10.0
libtpu: 0.0.40
codegen_flags: <defaults>
</compile_context>

<pallas_src>
import jax
import jax.numpy as jnp
from jax import lax
from jax.experimental import pallas as pl
from jax.experimental.pallas import tpu as pltpu

EPS = 1e-5
_MIB = 1024 * 1024


def _vmem_capacity_bytes():
    default = 64 * _MIB                      # conservative: v7x per-TC VMEM
    try:
        info = pltpu.get_tpu_info()
        cap = int(getattr(info, "vmem_capacity_bytes", default))
        if 16 * _MIB <= cap <= 1024 * _MIB:
            return cap
    except Exception:
        pass
    return default


_VMEM_CAP = _vmem_capacity_bytes()
# Scoped-VMEM budget requested for every kernel.
VMEM_LIMIT = int(min(_VMEM_CAP * 3 // 4, 112 * _MIB))
# Batch tile for the tiled path: large enough that DMA dominates the ~0.35 us
# per-grid-step fixed cost, small enough to double-buffer inside VMEM_LIMIT.
B_TILE = 16384 if _VMEM_CAP >= 128 * _MIB else 8192


def _full_spec(shape):
    return pl.BlockSpec(shape, lambda *_: (0,) * len(shape))


# ---------------------------------------------------------------------------
# Path 1: batch small enough -> one fused kernel, whole batch resident in VMEM.
# ---------------------------------------------------------------------------
def _mlp_fused_kernel(x_ref, w1_ref, w2_ref, w3_ref, p_ref, o_ref):
    """p_ref rows: 0=gamma1, 1=beta1, 2=gamma2, 3=beta2, 4=b3 (lane padded)."""
    n1 = w1_ref.shape[1]
    n2 = w2_ref.shape[1]
    a_dim = o_ref.shape[1]

    xb = x_ref[...].astype(jnp.bfloat16)

    # fc1 (bias cancelled by training-mode BN) + BN1 + relu; BN as one FMA.
    h1 = jnp.dot(xb, w1_ref[...], preferred_element_type=jnp.float32)
    m1 = jnp.mean(h1, axis=0, keepdims=True)
    d1 = h1 - m1
    v1 = jnp.mean(d1 * d1, axis=0, keepdims=True)          # biased batch var
    s1 = p_ref[0:1, 0:n1] * lax.rsqrt(v1 + EPS)
    t1 = p_ref[1:2, 0:n1] - m1 * s1
    a1 = jnp.maximum(h1 * s1 + t1, 0.0).astype(jnp.bfloat16)

    # fc2 + BN2 + relu
    h2 = jnp.dot(a1, w2_ref[...], preferred_element_type=jnp.float32)
    m2 = jnp.mean(h2, axis=0, keepdims=True)
    d2 = h2 - m2
    v2 = jnp.mean(d2 * d2, axis=0, keepdims=True)
    s2 = p_ref[2:3, 0:n2] * lax.rsqrt(v2 + EPS)
    t2 = p_ref[3:4, 0:n2] - m2 * s2
    a2 = jnp.maximum(h2 * s2 + t2, 0.0).astype(jnp.bfloat16)

    # fc3 (the .view(B, -1) is a no-op for 2-D activations)
    o_ref[...] = (jnp.dot(a2, w3_ref[...], preferred_element_type=jnp.float32)
                  + p_ref[4:5, 0:a_dim])


def _fused_vmem_bytes(B, S, n1, n2, a_dim):
    """Generous estimate of fused-path live VMEM (f32 + bf16 temporaries)."""
    per_row = 4 * (S + 2 * n1 + 2 * n2 + 2 * a_dim) + 2 * (S + n1 + n2)
    fixed = 2 * (S * n1 + n1 * n2 + n2 * a_dim) + 4 * 5 * max(n1, n2, a_dim)
    return 2 * (B * per_row + fixed)          # 2x fudge: compiler temps / io


def _mlp_forward_fused(x, kp):
    B, S = x.shape
    w1, w2, w3, p = kp["w1"], kp["w2"], kp["w3"], kp["p_fused"]
    n1, n2, a_dim = w1.shape[1], w2.shape[1], w3.shape[1]

    args = (x, w1, w2, w3, p)
    flops = 2 * B * (S * n1 + n1 * n2 + n2 * a_dim)
    bytes_accessed = (4 * B * (S + a_dim)
                      + 2 * (S * n1 + n1 * n2 + n2 * a_dim) + 4 * p.size)

    return pl.pallas_call(
        _mlp_fused_kernel,
        out_shape=jax.ShapeDtypeStruct((B, a_dim), jnp.float32),
        in_specs=[_full_spec(a.shape) for a in args],
        out_specs=_full_spec((B, a_dim)),
        compiler_params=pltpu.CompilerParams(vmem_limit_bytes=VMEM_LIMIT),
        cost_estimate=pl.CostEstimate(flops=flops, transcendentals=n1 + n2,
                                      bytes_accessed=bytes_accessed),
    )(*args)


# ---------------------------------------------------------------------------
# Path 2: large batch -> batch-tiled 3-pass pipeline (h1 never hits HBM).
#   pass 1: per-tile BN1 partial sums of h1 = x @ w1      (stats only)
#   pass 2: recompute h1, h2 = relu(BN1(h1)) @ w2 (bf16)  (+ BN2 partial sums)
#   pass 3: out = relu(BN2(h2)) @ w3 + b3
# BN scale/shift are derived in-kernel from the tiny stats arrays.
# ---------------------------------------------------------------------------
def _stats1_kernel(x_ref, w1_ref, st_ref):
    h1 = jnp.dot(x_ref[...].astype(jnp.bfloat16), w1_ref[...],
                 preferred_element_type=jnp.float32)
    # Direct row writes (no concatenate relayout).
    st_ref[0:1, 0:1, :] = jnp.sum(h1, axis=0, keepdims=True)[None]
    st_ref[0:1, 1:2, :] = jnp.sum(h1 * h1, axis=0, keepdims=True)[None]


def _make_fc2_kernel(b_true, b_tile, nb, padded):
    inv_n = 1.0 / b_true

    def kernel(x_ref, w1_ref, w2_ref, gb1_ref, st1_ref, h2_ref, st2_ref):
        # Combine per-tile BN1 sums in-kernel; fold gamma/beta into scale/shift.
        # NOTE: E[x^2]-mean^2 (clamped) -- fine for well-scaled activations,
        # less robust than E[(x-m)^2] for large-mean / tiny-variance features.
        st1 = st1_ref[...]
        mean1 = jnp.sum(st1[:, 0, :], axis=0, keepdims=True) * inv_n
        ex2 = jnp.sum(st1[:, 1, :], axis=0, keepdims=True) * inv_n
        var1 = jnp.maximum(ex2 - mean1 * mean1, 0.0)
        scale1 = gb1_ref[0:1, :] * lax.rsqrt(var1 + EPS)
        shift1 = gb1_ref[1:2, :] - mean1 * scale1

        # Recompute fc1 (cheap) instead of round-tripping h1 through HBM.
        h1 = jnp.dot(x_ref[...].astype(jnp.bfloat16), w1_ref[...],
                     preferred_element_type=jnp.float32)
        a1 = jnp.maximum(h1 * scale1 + shift1, 0.0).astype(jnp.bfloat16)
        h2 = jnp.dot(a1, w2_ref[...], preferred_element_type=jnp.float32)

        h2b = h2.astype(h2_ref.dtype)
        h2_ref[...] = h2b
        h2f = h2b.astype(jnp.float32)        # stats match what pass 3 reads

        if padded:
            is_last = pl.program_id(0) == nb - 1

            @pl.when(jnp.logical_not(is_last))
            def _():
                st2_ref[0:1, 0:1, :] = jnp.sum(h2f, axis=0, keepdims=True)[None]
                st2_ref[0:1, 1:2, :] = jnp.sum(h2f * h2f, axis=0,
                                               keepdims=True)[None]

            @pl.when(is_last)
            def _():
                # Only the stats need masking; padded h2 rows are sliced away.
                row = ((nb - 1) * b_tile
                       + lax.broadcasted_iota(jnp.int32, (b_tile, 1), 0))
                h2m = jnp.where(row < b_true, h2f, 0.0)
                st2_ref[0:1, 0:1, :] = jnp.sum(h2m, axis=0, keepdims=True)[None]
                st2_ref[0:1, 1:2, :] = jnp.sum(h2m * h2m, axis=0,
                                               keepdims=True)[None]
        else:
            st2_ref[0:1, 0:1, :] = jnp.sum(h2f, axis=0, keepdims=True)[None]
            st2_ref[0:1, 1:2, :] = jnp.sum(h2f * h2f, axis=0, keepdims=True)[None]

    return kernel


def _make_fc3_kernel(b_true, n2, a_dim):
    inv_n = 1.0 / b_true

    def kernel(h2_ref, w3_ref, p3_ref, st2_ref, o_ref):
        st2 = st2_ref[...]
        mean2 = jnp.sum(st2[:, 0, :], axis=0, keepdims=True) * inv_n
        ex2 = jnp.sum(st2[:, 1, :], axis=0, keepdims=True) * inv_n
        var2 = jnp.maximum(ex2 - mean2 * mean2, 0.0)
        scale2 = p3_ref[0:1, 0:n2] * lax.rsqrt(var2 + EPS)
        shift2 = p3_ref[1:2, 0:n2] - mean2 * scale2

        h2 = h2_ref[...].astype(jnp.float32)
        a2 = jnp.maximum(h2 * scale2 + shift2, 0.0).astype(jnp.bfloat16)
        o_ref[...] = (jnp.dot(a2, w3_ref[...], preferred_element_type=jnp.float32)
                      + p3_ref[2:3, 0:a_dim])

    return kernel


def _mlp_forward_tiled(x, kp, b_tile=None):
    if b_tile is None:
        b_tile = B_TILE
    B, S = x.shape
    w1, w2, w3 = kp["w1"], kp["w2"], kp["w3"]
    n1, n2, a_dim = w1.shape[1], w2.shape[1], w3.shape[1]

    nb = pl.cdiv(B, b_tile)
    b_pad = nb * b_tile
    padded = b_pad != B
    if padded:
        # Zero rows produce h1 == 0 exactly (no fc1 bias in the kernel), so
        # they contribute nothing to the BN1 partial sums.
        x = jnp.pad(x, ((0, b_pad - B), (0, 0)))

    cp = pltpu.CompilerParams(dimension_semantics=("parallel",),
                              vmem_limit_bytes=VMEM_LIMIT)

    # ---- pass 1: per-tile BN1 partial sums (h1 is NOT written to HBM) ----
    st1 = pl.pallas_call(
        _stats1_kernel,
        out_shape=jax.ShapeDtypeStruct((nb, 2, n1), jnp.float32),
        grid=(nb,),
        in_specs=[pl.BlockSpec((b_tile, S), lambda i: (i, 0)),
                  pl.BlockSpec((S, n1), lambda i: (0, 0))],
        out_specs=pl.BlockSpec((1, 2, n1), lambda i: (i, 0, 0)),
        compiler_params=cp,
        cost_estimate=pl.CostEstimate(
            flops=2 * b_pad * S * n1, transcendentals=0,
            bytes_accessed=4 * b_pad * S + 2 * S * n1 + 4 * nb * 2 * n1),
    )(x, w1)

    # ---- pass 2: h2 = bf16( relu(BN1(x@w1)) @ w2 ) + per-tile BN2 sums ----
    h2, st2 = pl.pallas_call(
        _make_fc2_kernel(B, b_tile, nb, padded),
        out_shape=(jax.ShapeDtypeStruct((b_pad, n2), jnp.bfloat16),
                   jax.ShapeDtypeStruct((nb, 2, n2), jnp.float32)),
        grid=(nb,),
        in_specs=[pl.BlockSpec((b_tile, S), lambda i: (i, 0)),
                  pl.BlockSpec((S, n1), lambda i: (0, 0)),
                  pl.BlockSpec((n1, n2), lambda i: (0, 0)),
                  pl.BlockSpec((2, n1), lambda i: (0, 0)),
                  pl.BlockSpec((nb, 2, n1), lambda i: (0, 0, 0))],
        out_specs=(pl.BlockSpec((b_tile, n2), lambda i: (i, 0)),
                   pl.BlockSpec((1, 2, n2), lambda i: (i, 0, 0))),
        compiler_params=cp,
        cost_estimate=pl.CostEstimate(
            flops=2 * b_pad * (S * n1 + n1 * n2), transcendentals=n1,
            bytes_accessed=(4 * b_pad * S + 2 * b_pad * n2
                            + 2 * (S * n1 + n1 * n2) + 4 * nb * 2 * (n1 + n2))),
    )(x, w1, w2, kp["gb1"], st1)

    # ---- pass 3: out = relu(BN2(h2)) @ w3 + b3 ----
    out = pl.pallas_call(
        _make_fc3_kernel(B, n2, a_dim),
        out_shape=jax.ShapeDtypeStruct((b_pad, a_dim), jnp.float32),
        grid=(nb,),
        in_specs=[pl.BlockSpec((b_tile, n2), lambda i: (i, 0)),
                  pl.BlockSpec((n2, a_dim), lambda i: (0, 0)),
                  pl.BlockSpec((3, kp["p3"].shape[1]), lambda i: (0, 0)),
                  pl.BlockSpec((nb, 2, n2), lambda i: (0, 0, 0))],
        out_specs=pl.BlockSpec((b_tile, a_dim), lambda i: (i, 0)),
        compiler_params=cp,
        cost_estimate=pl.CostEstimate(
            flops=2 * b_pad * n2 * a_dim, transcendentals=n2,
            bytes_accessed=(2 * b_pad * n2 + 4 * b_pad * a_dim
                            + 2 * n2 * a_dim + 4 * nb * 2 * n2)),
    )(h2, w3, kp["p3"], st2)

    return out[:B]


def _mlp_forward(x, kp):
    B, S = x.shape
    n1 = kp["w1"].shape[1]
    n2 = kp["w2"].shape[1]
    a_dim = kp["w3"].shape[1]
    if _fused_vmem_bytes(B, S, n1, n2, a_dim) <= int(0.9 * VMEM_LIMIT):
        return _mlp_forward_fused(x, kp)
    return _mlp_forward_tiled(x, kp)


mlp_forward = jax.jit(_mlp_forward)


# ---------------------------------------------------------------------------
# Parameters (mimic nn.Linear / nn.BatchNorm1d defaults), one-time packing,
# and the pure-JAX f32 reference.
# ---------------------------------------------------------------------------
def init_params(key, state_size, action_size):
    ks = jax.random.split(key, 6)

    def linear(kw, kb, fan_in, fan_out):
        bound = 1.0 / jnp.sqrt(jnp.float32(fan_in))
        w = jax.random.uniform(kw, (fan_in, fan_out), jnp.float32, -bound, bound)
        b = jax.random.uniform(kb, (fan_out,), jnp.float32, -bound, bound)
        return w, b

    w1, b1 = linear(ks[0], ks[1], state_size, 64)
    w2, b2 = linear(ks[2], ks[3], 64, 32)
    w3, b3 = linear(ks[4], ks[5], 32, action_size)
    return dict(
        w1=w1, b1=b1, g1=jnp.ones((64,), jnp.float32), be1=jnp.zeros((64,), jnp.float32),
        w2=w2, b2=b2, g2=jnp.ones((32,), jnp.float32), be2=jnp.zeros((32,), jnp.float32),
        w3=w3, b3=b3,
    )


def prepare_params(p):
    """One-time packing: bf16 weights + packed per-feature vectors.

    fc1/fc2 biases are dropped: a Linear bias followed by training-mode
    BatchNorm is exactly cancelled by the batch-mean subtraction.
    """
    n1, n2, a_dim = p["w1"].shape[1], p["w2"].shape[1], p["w3"].shape[1]

    W = max(n1, n2, a_dim)
    pf = jnp.zeros((5, W), jnp.float32)
    pf = (pf.at[0, :n1].set(p["g1"]).at[1, :n1].set(p["be1"])
            .at[2, :n2].set(p["g2"]).at[3, :n2].set(p["be2"])
            .at[4, :a_dim].set(p["b3"]))

    gb1 = jnp.stack([p["g1"], p["be1"]], axis=0)           # (2, n1)

    w2p = max(n2, a_dim)
    p3 = jnp.zeros((3, w2p), jnp.float32)
    p3 = (p3.at[0, :n2].set(p["g2"]).at[1, :n2].set(p["be2"])
            .at[2, :a_dim].set(p["b3"]))

    return dict(w1=p["w1"].astype(jnp.bfloat16),
                w2=p["w2"].astype(jnp.bfloat16),
                w3=p["w3"].astype(jnp.bfloat16),
                p_fused=pf, gb1=gb1, p3=p3)


def mlp_reference(x, p):
    """Pure-JAX f32 mirror of the PyTorch module (training-mode BN), incl. b1/b2."""
    h1 = x @ p["w1"] + p["b1"]
    m = h1.mean(0)
    v = ((h1 - m) ** 2).mean(0)
    a1 = jnp.maximum((h1 - m) / jnp.sqrt(v + EPS) * p["g1"] + p["be1"], 0.0)
    h2 = a1 @ p["w2"] + p["b2"]
    m = h2.mean(0)
    v = ((h2 - m) ** 2).mean(0)
    a2 = jnp.maximum((h2 - m) / jnp.sqrt(v + EPS) * p["g2"] + p["be2"], 0.0)
    return a2 @ p["w3"] + p["b3"]


# TODO(synk): BatchNorm running-stats (momentum buffers) side-effect of PyTorch
# training-mode forward is not materialized; only the forward output is produced.

if __name__ == "__main__":
    key = jax.random.PRNGKey(0)
    k_small, k_big, k_p = jax.random.split(key, 3)

    state_size, action_size = 16, 4
    params = init_params(k_p, state_size, action_size)
    kparams = prepare_params(params)

    # bf16 matmul operands + two BN normalizations amplify rounding relative to
    # the exact-f32 reference, so compare with a bf16-appropriate tolerance.
    TOL = dict(rtol=1e-1, atol=1e-1)

    # Small batch -> fully fused single-kernel path.
    x_small = jax.random.normal(k_small, (8, state_size), jnp.float32)
    out_small = jax.block_until_ready(mlp_forward(x_small, kparams))
    ref_small = mlp_reference(x_small, params)
    assert out_small.shape == (8, action_size)
    assert bool(jnp.allclose(out_small, ref_small, **TOL)), \
        float(jnp.max(jnp.abs(out_small - ref_small)))

    # Tiled 3-pass path, exercised directly with a small tile so the test stays
    # modest: 3 batch tiles + padding mask on the last tile.
    x_big = jax.random.normal(k_big, (10000, state_size), jnp.float32)
    out_big = jax.block_until_ready(_mlp_forward_tiled(x_big, kparams, b_tile=4096))
    ref_big = mlp_reference(x_big, params)
    assert out_big.shape == (10000, action_size)
    assert bool(jnp.allclose(out_big, ref_big, **TOL)), \
        float(jnp.max(jnp.abs(out_big - ref_big)))

    print("KERNEL_OK")
</pallas_src>

<mosaic_0001>
module attributes {stable_mosaic.version = 11 : i64} {
  func.func @_mlp_fused_kernel(%arg0: memref<8x16xf32, #tpu.memory_space<vmem>>, %arg1: memref<16x64xbf16, #tpu.memory_space<vmem>>, %arg2: memref<64x32xbf16, #tpu.memory_space<vmem>>, %arg3: memref<32x4xbf16, #tpu.memory_space<vmem>>, %arg4: memref<5x64xf32, #tpu.memory_space<vmem>>, %arg5: memref<8x4xf32, #tpu.memory_space<vmem>>) attributes {dimension_semantics = [], scalar_prefetch = 0 : i64, scratch_operands = 0 : i64, tpu.core_type = #tpu.core_type<tc>} {
    %c0 = arith.constant 0 : index
    %c0_0 = arith.constant 0 : index
    %0 = vector.load %arg0[%c0, %c0_0] : memref<8x16xf32, #tpu.memory_space<vmem>>, vector<8x16xf32>
    %1 = arith.truncf %0 : vector<8x16xf32> to vector<8x16xbf16>
    %c0_1 = arith.constant 0 : index
    %c0_2 = arith.constant 0 : index
    %2 = vector.load %arg1[%c0_1, %c0_2] : memref<16x64xbf16, #tpu.memory_space<vmem>>, vector<16x64xbf16>
    %cst = arith.constant dense<0.000000e+00> : vector<8x64xf32>
    %3 = tpu.matmul %1, %2, %cst {dimension_numbers = #tpu.dot_dimension_numbers<[1], [0], [0], [1], [0, 0, 1, 1], [], []>} : vector<8x16xbf16>, vector<16x64xbf16>, vector<8x64xf32> -> vector<8x64xf32>
    %cst_3 = arith.constant dense<0.000000e+00> : vector<64xf32>
    %4 = vector.multi_reduction <add>, %3, %cst_3 [0] : vector<8x64xf32> to vector<64xf32>
    %5 = vector.shape_cast %4 : vector<64xf32> to vector<1x64xf32>
    %cst_4 = arith.constant 8.000000e+00 : f32
    %6 = vector.broadcast %cst_4 : f32 to vector<1x64xf32>
    %7 = arith.divf %5, %6 : vector<1x64xf32>
    %8 = vector.broadcast %7 : vector<1x64xf32> to vector<8x64xf32>
    %9 = arith.subf %3, %8 : vector<8x64xf32>
    %10 = arith.mulf %9, %9 : vector<8x64xf32>
    %cst_5 = arith.constant dense<0.000000e+00> : vector<64xf32>
    %11 = vector.multi_reduction <add>, %10, %cst_5 [0] : vector<8x64xf32> to vector<64xf32>
    %12 = vector.shape_cast %11 : vector<64xf32> to vector<1x64xf32>
    %cst_6 = arith.constant 8.000000e+00 : f32
    %13 = vector.broadcast %cst_6 : f32 to vector<1x64xf32>
    %14 = arith.divf %12, %13 : vector<1x64xf32>
    %c0_7 = arith.constant 0 : index
    %c0_8 = arith.constant 0 : index
    %15 = vector.load %arg4[%c0_7, %c0_8] : memref<5x64xf32, #tpu.memory_space<vmem>>, vector<1x64xf32>
    %cst_9 = arith.constant 9.99999974E-6 : f32
    %16 = vector.broadcast %cst_9 : f32 to vector<1x64xf32>
    %17 = arith.addf %14, %16 : vector<1x64xf32>
    %18 = math.rsqrt %17 : vector<1x64xf32>
    %19 = arith.mulf %15, %18 : vector<1x64xf32>
    %c1 = arith.constant 1 : index
    %c0_10 = arith.constant 0 : index
    %20 = vector.load %arg4[%c1, %c0_10] : memref<5x64xf32, #tpu.memory_space<vmem>>, vector<1x64xf32>
    %21 = arith.mulf %7, %19 : vector<1x64xf32>
    %22 = arith.subf %20, %21 : vector<1x64xf32>
    %23 = vector.broadcast %19 : vector<1x64xf32> to vector<8x64xf32>
    %24 = arith.mulf %3, %23 : vector<8x64xf32>
    %25 = vector.broadcast %22 : vector<1x64xf32> to vector<8x64xf32>
    %26 = arith.addf %24, %25 : vector<8x64xf32>
    %cst_11 = arith.constant 0.000000e+00 : f32
    %27 = vector.broadcast %cst_11 : f32 to vector<8x64xf32>
    %28 = arith.maximumf %26, %27 : vector<8x64xf32>
    %29 = arith.truncf %28 : vector<8x64xf32> to vector<8x64xbf16>
    %c0_12 = arith.constant 0 : index
    %c0_13 = arith.constant 0 : index
    %30 = vector.load %arg2[%c0_12, %c0_13] : memref<64x32xbf16, #tpu.memory_space<vmem>>, vector<64x32xbf16>
    %cst_14 = arith.constant dense<0.000000e+00> : vector<8x32xf32>
    %31 = tpu.matmul %29, %30, %cst_14 {dimension_numbers = #tpu.dot_dimension_numbers<[1], [0], [0], [1], [0, 0, 1, 1], [], []>} : vector<8x64xbf16>, vector<64x32xbf16>, vector<8x32xf32> -> vector<8x32xf32>
    %cst_15 = arith.constant dense<0.000000e+00> : vector<32xf32>
    %32 = vector.multi_reduction <add>, %31, %cst_15 [0] : vector<8x32xf32> to vector<32xf32>
    %33 = vector.shape_cast %32 : vector<32xf32> to vector<1x32xf32>
    %cst_16 = arith.constant 8.000000e+00 : f32
    %34 = vector.broadcast %cst_16 : f32 to vector<1x32xf32>
    %35 = arith.divf %33, %34 : vector<1x32xf32>
    %36 = vector.broadcast %35 : vector<1x32xf32> to vector<8x32xf32>
    %37 = arith.subf %31, %36 : vector<8x32xf32>
    %38 = arith.mulf %37, %37 : vector<8x32xf32>
    %cst_17 = arith.constant dense<0.000000e+00> : vector<32xf32>
    %39 = vector.multi_reduction <add>, %38, %cst_17 [0] : vector<8x32xf32> to vector<32xf32>
    %40 = vector.shape_cast %39 : vector<32xf32> to vector<1x32xf32>
    %cst_18 = arith.constant 8.000000e+00 : f32
    %41 = vector.broadcast %cst_18 : f32 to vector<1x32xf32>
    %42 = arith.divf %40, %41 : vector<1x32xf32>
    %c2 = arith.constant 2 : index
    %c0_19 = arith.constant 0 : index
    %43 = vector.load %arg4[%c2, %c0_19] : memref<5x64xf32, #tpu.memory_space<vmem>>, vector<1x32xf32>
    %cst_20 = arith.constant 9.99999974E-6 : f32
    %44 = vector.broadcast %cst_20 : f32 to vector<1x32xf32>
    %45 = arith.addf %42, %44 : vector<1x32xf32>
    %46 = math.rsqrt %45 : vector<1x32xf32>
    %47 = arith.mulf %43, %46 : vector<1x32xf32>
    %c3 = arith.constant 3 : index
    %c0_21 = arith.constant 0 : index
    %48 = vector.load %arg4[%c3, %c0_21] : memref<5x64xf32, #tpu.memory_space<vmem>>, vector<1x32xf32>
    %49 = arith.mulf %35, %47 : vector<1x32xf32>
    %50 = arith.subf %48, %49 : vector<1x32xf32>
    %51 = vector.broadcast %47 : vector<1x32xf32> to vector<8x32xf32>
    %52 = arith.mulf %31, %51 : vector<8x32xf32>
    %53 = vector.broadcast %50 : vector<1x32xf32> to vector<8x32xf32>
    %54 = arith.addf %52, %53 : vector<8x32xf32>
    %cst_22 = arith.constant 0.000000e+00 : f32
    %55 = vector.broadcast %cst_22 : f32 to vector<8x32xf32>
    %56 = arith.maximumf %54, %55 : vector<8x32xf32>
    %57 = arith.truncf %56 : vector<8x32xf32> to vector<8x32xbf16>
    %c0_23 = arith.constant 0 : index
    %c0_24 = arith.constant 0 : index
    %58 = vector.load %arg3[%c0_23, %c0_24] : memref<32x4xbf16, #tpu.memory_space<vmem>>, vector<32x4xbf16>
    %cst_25 = arith.constant dense<0.000000e+00> : vector<8x4xf32>
    %59 = tpu.matmul %57, %58, %cst_25 {dimension_numbers = #tpu.dot_dimension_numbers<[1], [0], [0], [1], [0, 0, 1, 1], [], []>} : vector<8x32xbf16>, vector<32x4xbf16>, vector<8x4xf32> -> vector<8x4xf32>
    %c4 = arith.constant 4 : index
    %c0_26 = arith.constant 0 : index
    %60 = vector.load %arg4[%c4, %c0_26] : memref<5x64xf32, #tpu.memory_space<vmem>>, vector<1x4xf32>
    %61 = vector.broadcast %60 : vector<1x4xf32> to vector<8x4xf32>
    %62 = arith.addf %59, %61 : vector<8x4xf32>
    %c0_27 = arith.constant 0 : index
    %c0_28 = arith.constant 0 : index
    %63 = vector.load %arg5[%c0_27, %c0_28] : memref<8x4xf32, #tpu.memory_space<vmem>>, vector<8x4xf32>
    tpu.vector_store %arg5[%c0_27, %c0_28], %62 {strides = array<i32>} : memref<8x4xf32, #tpu.memory_space<vmem>>, vector<8x4xf32>,
    return
  }
}

</mosaic_0001>

<bundles_post_ra>
// kernel: _mlp_forward.1
= control target key start
LH: loop header
LB: loop body
LE: loop exit
PB: predicated region body
PF: predicated region fallthrough
CT: control target
= control target key end

     0   :  { %v357_v0 = vmov 0.0   ;;  %vm358_vm0 = vmmov 0   ;;  %vm31_vm1 = vcmask 130048   ;;  %vm75_vm2 = vcmask 523264   ;;  %s447_s1 = inlined_call_operand.vmem [shape: bf16[16,64], index: 1, kind: input, shape index: {}]   ;;  %s448_s0 = inlined_call_operand.vmem [shape: f32[8,16], index: 0, kind: input, shape index: {}]   ;;  %s449_s2 = inlined_call_operand.vmem [shape: bf16[64,32], index: 2, kind: input, shape index: {}]   ;;  %s450_s4 = inlined_call_operand.vmem [shape: f32[5,64], index: 4, kind: input, shape index: {}]   ;;  %s451_s3 = inlined_call_operand.vmem [shape: bf16[32,4], index: 3, kind: input, shape index: {}]   ;;  %s452_s5 = inlined_call_operand.vmem [shape: f32[8,4], index: 5, kind: output, shape index: {}]  }
   0x1   :  { %318 = vmatprep.subr.bf16.mxu0 %v357_v0  ;;  %v346_v1 = vld [vmem:[%s447_s1] sm:$0xff]   ;;  %320 = vmatprep.mubr.msk.bf16.mxu0 %vm358_vm0, %v357_v0  ;;  %v348_v5 = vld [vmem:[%s449_s2 + $0x8] sm:$0xff]   ;;  %v349_v6 = vld [vmem:[%s449_s2 + $0x10] sm:$0xff]   ;;  %v102_v31 = vlaneseq  ;;  %vm189_vm3 = vcmask 261120   ;;  %vm291_vm4 = vcmask 31744  }
   0x2   :  { %v21_v2 = vld [vmem:[%s448_s0] sm:$0xff]  ;;  %324 = vmatprep.subr.bf16.mxu1 %v357_v0  ;;  %332 = vmatprep.mubr.msk.bf16.mxu1 %vm358_vm0, %v357_v0  ;;  %v350_v7 = vld [vmem:[%s449_s2 + $0x18] sm:$0xff]   ;;  %v352_v47 = vld [vmem:[%s451_s3 + $0x8] sm:$0xff]  }
   0x3   :  { %319 = vmatpush3.bf16.msra.mxu0 %v346_v1  ;;  %v22_v3 = vpack.c.bf16 %v21_v2, %v21_v2  ;;  %v347_v4 = vld [vmem:[%s449_s2] sm:$0xff]   ;;  %v103_v32 = vshrl.u32 %v102_v31, 7 }
   0x4   :  { %336 = vmatprep.subr.bf16.mxu0 %v357_v0  ;;  %325 = vmatpush3.bf16.msra.mxu1 %v347_v4  ;;  %v95_v33 = vld [vmem:[%s450_s4] sm:$0x1]  ;;  %v99_v37 = vld [vmem:[%s450_s4 + $0x1] sm:$0x1] }
   0x5   :  { %326 = vmatprep.subr.bf16.mxu1 %v357_v0  ;;  %v104_v34 = vsub.s32 0, %v103_v32  ;;  %v351_v46 = vld [vmem:[%s451_s3] sm:$0xff]  }
   0x6   :  { %321 = vmatmul.mubr.msk.bf16.vlgmr.msra.gmra.mrb[0].mxu0 %vm31_vm1, %v22_v3 }
   0x7   :  { %340 = vmatprep.mubr.msk.bf16.mxu0 %vm358_vm0, %v357_v0  ;;  %337 = vmatpush3.bf16.msra.mxu0 %v351_v46 }
   0x8   :  { %327 = vmatpush3.bf16.msra.mxu1 %v348_v5  ;;  %338 = vmatprep.subr.bf16.mxu0 %v357_v0 }
   0x9   :  { %328 = vmatprep.subr.bf16.mxu1 %v357_v0 }
   0xb   :  { %339 = vmatpush3.bf16.msra.mxu0 %v352_v47 }
   0xc   :  { %329 = vmatpush3.bf16.msra.mxu1 %v349_v6 }
   0xd   :  { %330 = vmatprep.subr.bf16.mxu1 %v357_v0 }
  0x10   :  { %331 = vmatpush3.bf16.msra.mxu1 %v350_v7  ;;  %v208_v7 = vld [vmem:[%s450_s4 + $0x2] sm:$0x1] }
  0xd9   :  { %v69_v8 = vpop.f32.mrb[0].mxu0 }
  0xda   :  { %v76_v9 = vsel %vm75_vm2, %v69_v8, 0.0  ;;  %v322_v10 = vpop.f32.mrb[1].mxu0 }
  0xdb   :  { %v77_v11 = vrot.slane %v76_v9, 4  ;;  %v72_v12 = vpop.f32.mrb[2].mxu0  ;;  %v212_v10 = vld [vmem:[%s450_s4 + $0x3] sm:$0x1] }
  0xdc   :  { %v323_v13 = vpop.f32.mrb[3].mxu0 }
  0xdd   :  { %v78_v14 = vadd.f32 %v77_v11, %v76_v9 }
  0xdf   :  { %v79_v15 = vrot.slane %v78_v14, 2 }
  0xe1   :  { %v80_v16 = vadd.f32 %v79_v15, %v78_v14 }
  0xe3   :  { %v81_v17 = vrot.slane %v80_v16, 1 }
  0xe5   :  { %v82_v18 = vadd.f32 %v81_v17, %v80_v16 }
  0xe7   :  { %v84_v19 = vmul.f32 0.125, %v82_v18 }
  0xe9   :  { %v85_v20 = vsub.f32 %v69_v8, %v84_v19 }
  0xeb   :  { %v86_v21 = vmul.f32 %v85_v20, %v85_v20 }
  0xed   :  { %v87_v22 = vsel %vm75_vm2, %v86_v21, 0.0 }
  0xee   :  { %v88_v23 = vrot.slane %v87_v22, 4 }
  0xf0   :  { %v89_v24 = vadd.f32 %v88_v23, %v87_v22 }
  0xf2   :  { %v90_v25 = vrot.slane %v89_v24, 2 }
  0xf4   :  { %v91_v26 = vadd.f32 %v90_v25, %v89_v24 }
  0xf6   :  { %v92_v27 = vrot.slane %v91_v26, 1 }
  0xf8   :  { %v93_v28 = vadd.f32 %v92_v27, %v91_v26 }
  0xfa   :  { %v94_v29 = vmul.f32 0.125, %v93_v28 }
  0xfc   :  { %v96_v30 = vadd.f32 1e-05, %v94_v29 }
  0xfe   :  { %353 = vrsqrt.f32 %v96_v30 }
 0x108   :  { %v354_v35 = vpop.eup %353 }
 0x109   :  { %v98_v36 = vmul.f32 %v354_v35, %v95_v33 }
 0x10b   :  { %v100_v38 = vmul.f32 %v98_v36, %v84_v19  ;;  %v105_v39 = vrot.slane %v98_v36, %v104_v34  ;;  %v304_v19 = vld [vmem:[%s450_s4 + $0x4] ss:$0 sm:$0xff] }
 0x10d   :  { %v101_v40 = vsub.f32 %v99_v37, %v100_v38  ;;  %v106_v41 = vmul.f32 %v105_v39, %v69_v8 }
 0x10f   :  { %v110_v42 = vrot.slane %v101_v40, %v104_v34 }
 0x111   :  { %v111_v43 = vadd.f32 %v110_v42, %v106_v41 }
 0x113   :  { %v112_v44 = vmax.f32 %v111_v43, 0.0 }
 0x115   :  { %v113_v45 = vpack.c.bf16 %v112_v44, %v112_v44 }
 0x117   :  { %333 = vmatmul.mubr.msk.bf16.vlgmr.msra.gmra.mrb[0].mxu1 %vm75_vm2, %v113_v45 }
 0x1ea   :  { %v183_v48 = vpop.f32.mrb[0].mxu1 }
 0x1eb   :  { %v190_v49 = vsel %vm189_vm3, %v183_v48, 0.0  ;;  %v334_v50 = vpop.f32.mrb[1].mxu1 }
 0x1ec   :  { %v191_v51 = vrot.slane %v190_v49, 4  ;;  %v186_v52 = vpop.f32.mrb[2].mxu1 }
 0x1ed   :  { %v335_v53 = vpop.f32.mrb[3].mxu1 }
 0x1ee   :  { %v192_v54 = vadd.f32 %v191_v51, %v190_v49 }
 0x1f0   :  { %v193_v55 = vrot.slane %v192_v54, 2 }
 0x1f2   :  { %v194_v56 = vadd.f32 %v193_v55, %v192_v54 }
 0x1f4   :  { %v195_v57 = vrot.slane %v194_v56, 1 }
 0x1f6   :  { %v196_v58 = vadd.f32 %v195_v57, %v194_v56 }
 0x1f8   :  { %v197_v59 = vmul.f32 0.125, %v196_v58 }
 0x1fa   :  { %v198_v60 = vsub.f32 %v183_v48, %v197_v59 }
 0x1fc   :  { %v199_v61 = vmul.f32 %v198_v60, %v198_v60 }
 0x1fe   :  { %v200_v62 = vsel %vm189_vm3, %v199_v61, 0.0 }
 0x1ff   :  { %v201_v63 = vrot.slane %v200_v62, 4 }
 0x201   :  { %v202_v0 = vadd.f32 %v201_v63, %v200_v62 }
 0x203   :  { %v203_v1 = vrot.slane %v202_v0, 2 }
 0x205   :  { %v204_v2 = vadd.f32 %v203_v1, %v202_v0 }
 0x207   :  { %v205_v3 = vrot.slane %v204_v2, 1 }
 0x209   :  { %v206_v4 = vadd.f32 %v205_v3, %v204_v2 }
 0x20b   :  { %v207_v5 = vmul.f32 0.125, %v206_v4 }
 0x20d   :  { %v209_v6 = vadd.f32 1e-05, %v207_v5 }
 0x20f   :  { %355 = vrsqrt.f32 %v209_v6 }
 0x219   :  { %v356_v8 = vpop.eup %355 }
 0x21a   :  { %v211_v9 = vmul.f32 %v356_v8, %v208_v7 }
 0x21c   :  { %v213_v11 = vmul.f32 %v211_v9, %v197_v59  ;;  %v218_v12 = vrot.slane %v211_v9, %v104_v34 }
 0x21e   :  { %v214_v13 = vsub.f32 %v212_v10, %v213_v11  ;;  %v219_v14 = vmul.f32 %v218_v12, %v183_v48 }
 0x220   :  { %v223_v15 = vrot.slane %v214_v13, %v104_v34 }
 0x222   :  { %v224_v16 = vadd.f32 %v223_v15, %v219_v14 }
 0x224   :  { %v225_v17 = vmax.f32 %v224_v16, 0.0 }
 0x226   :  { %v226_v18 = vpack.c.bf16 %v225_v17, %v225_v17 }
 0x228   :  { %341 = vmatmul.mubr.msk.bf16.vlgmr.msra.gmra.mrb[4].mxu0 %vm189_vm3, %v226_v18 }
 0x2fb   :  { %v285_v20 = vpop.f32.mrb[4].mxu0 }
 0x2fc   :  { %v286_v21 = vadd.f32 %v304_v19, %v285_v20  ;;  %v342_v22 = vpop.f32.mrb[5].mxu0 }
 0x2fd   :  { %v288_v23 = vpop.f32.mrb[6].mxu0 }
 0x2fe   :  { %292 = vst.msk [vmem:[%s452_s5] sm:$0xff] %vm291_vm4, %v286_v21  ;;  %v343_v24 = vpop.f32.mrb[7].mxu0 }

</bundles_post_ra>
